<compile_context>
chip_gen: v6e
topology: v6e:2x2x1
jax: 0.10.0
libtpu: 0.0.40
codegen_flags: <defaults>
</compile_context>

<pallas_src>
import math

import jax
import jax.numpy as jnp
from jax import lax
from jax.experimental import pallas as pl
from jax.experimental.pallas import tpu as pltpu


def _pick_tile(dim, target, align):
    """Largest multiple of `align` <= target that divides `dim`; else the full dim."""
    if dim <= target:
        return dim
    t = (target // align) * align
    while t >= align:
        if dim % t == 0:
            return t
        t -= align
    return dim


def _rup(v, m):
    return -(-v // m) * m


# ---------------------------------------------------------------------------
# Fused kernel: implicit filter MLP + causal depthwise long conv + residual
#   y[t, c] = x[t, c] + sum_{s=0..t} k[s, c] * x[t - s, c]
# (exactly what fft_conv's zero-padded rfft/irfft + `out = y + u` computes)
# ---------------------------------------------------------------------------
def _implicit_conv_kernel(z_ref, w1_ref, b1_ref, w2_ref, b2_ref, x_ref, o_ref,
                          k_ref, xpad_ref):
    L, TN = x_ref.shape           # full sequence length, channel-tile width (lanes)
    TL = o_ref.shape[0]           # query (output-time) tile height (sublanes)
    q = pl.program_id(2)          # query-tile index; MUST be the innermost,
                                  # "arbitrary" (never megacore-sharded) grid axis
    q_lo = q * TL

    # ---- once per (batch, channel tile): implicit filter MLP + tiny pad slab ----
    # Scratches persist across the q sweep of this (batch, channel tile); q == 0
    # always runs first on the core that owns it because q is the innermost
    # "arbitrary" axis (documented assumption, see the wrapper).
    @pl.when(q == 0)
    def _():
        h = jnp.dot(z_ref[...], w1_ref[...], preferred_element_type=jnp.float32)
        h = jnp.maximum(h + b1_ref[...], 0.0)
        k_ref[...] = (jnp.dot(h, w2_ref[...], preferred_element_type=jnp.float32)
                      + b2_ref[...])
        # [TL zeros ; x[0:TL]] -- the zero rows implement the causal mask for the
        # <= TL shifts whose source window crosses t < 0.
        xpad_ref[0:TL, :] = jnp.zeros((TL, TN), jnp.float32)
        xpad_ref[TL:2 * TL, :] = x_ref[0:TL, :].astype(jnp.float32)

    # ---- register-carried accumulator, initialized with the residual (y + u) ----
    acc = x_ref[pl.ds(pl.multiple_of(q_lo, 8), TL), :].astype(jnp.float32)

    # ---- main shifts s in [0, q_lo): source window fully inside x (no masking) ---
    # 8 shifts per iteration: one aligned (8, TN) filter load, static inner unroll.
    def main_block(blk, acc):
        s_base = pl.multiple_of(blk * 8, 8)
        kblk = k_ref[pl.ds(s_base, 8), :]                       # (8, TN)
        for r in range(8):                                      # static unroll
            win = x_ref[pl.ds(q_lo - s_base - r, TL), :]        # x[t - s]
            acc = acc + win.astype(jnp.float32) * kblk[r:r + 1, :]
        return acc

    acc = lax.fori_loop(0, q * (TL // 8), main_block, acc)

    # ---- epilogue shifts s = q_lo + m, m in [0, TL): window crosses t = 0 --------
    def epi_block(blk, acc):
        m_base = pl.multiple_of(blk * 8, 8)
        kblk = k_ref[pl.ds(q_lo + m_base, 8), :]
        for r in range(8):                                      # static unroll
            m = m_base + r
            win = xpad_ref[pl.ds(TL - m, TL), :]                # zeros where t < s
            acc = acc + win * kblk[r:r + 1, :]
        return acc

    acc = lax.fori_loop(0, TL // 8, epi_block, acc)
    for m in range(8 * (TL // 8), TL):                          # static remainder
        win = xpad_ref[pl.ds(TL - m, TL), :]
        acc = acc + win * k_ref[pl.ds(q_lo + m, 1), :]

    o_ref[...] = acc.astype(o_ref.dtype)


# ---------------------------------------------------------------------------
# Wrapper
# ---------------------------------------------------------------------------
def implicit_long_convolution(x, params):
    """x: (b, l, d) -> (b, l, d); implicit-filter causal depthwise conv + residual."""
    b, l, d = x.shape
    z = params["z"][0, :l]                        # (l, d_emb) == pos_emb(l)
    w1, b1, w2, b2 = params["w1"], params["b1"], params["w2"], params["b2"]
    d_emb, d_hidden = w1.shape

    tl = _pick_tile(l, target=64, align=8)        # query-time tile (sublane axis)
    tn = _pick_tile(d, target=256, align=128)     # channel tile (lane axis)
    # Guard the pathological _pick_tile fallback (tl == l for a large l with no
    # 8-aligned divisor): the accumulator is (tl, tn) and must stay small.
    assert tl <= 512, "pad the sequence: l needs an 8-aligned tile divisor <= 64"
    assert l % tl == 0 and d % tn == 0

    # Grid: (batch, channel tiles) are "parallel" (megacore-shardable); the query
    # axis MUST stay innermost and "arbitrary": the filter / pad scratches filled
    # at q == 0 persist across the q sweep of each (batch, channel tile).
    grid = (b, d // tn, l // tl)

    itemsize = x.dtype.itemsize
    vmem_est = (
        2 * _rup(l, 8) * _rup(d_emb, 128) * 4            # z (double-buffered)
        + 2 * _rup(d_emb, 8) * _rup(d_hidden, 128) * 4   # w1
        + 2 * 8 * _rup(d_hidden, 128) * 4                # b1
        + 2 * _rup(d_hidden, 8) * _rup(tn, 128) * 4      # w2 channel tile
        + 2 * 8 * _rup(tn, 128) * 4                      # b2 channel tile
        + 2 * _rup(l, 8) * _rup(tn, 128) * itemsize      # x block
        + 2 * _rup(tl, 8) * _rup(tn, 128) * itemsize     # out block
        + _rup(l, 8) * _rup(tn, 128) * 4                 # k scratch
        + _rup(2 * tl, 8) * _rup(tn, 128) * 4            # causal pad scratch
    )
    vmem_limit = int(min(100 * 2**20, max(32 * 2**20, vmem_est * 5 // 4)))

    flops = b * d * l * (l + 1) + 2 * b * l * (d_emb * d_hidden + d_hidden * d)
    bytes_accessed = 2 * x.size * itemsize + 4 * (z.size + w1.size + b1.size
                                                  + w2.size + b2.size)

    return pl.pallas_call(
        _implicit_conv_kernel,
        out_shape=jax.ShapeDtypeStruct((b, l, d), x.dtype),
        grid=grid,
        in_specs=[
            pl.BlockSpec((l, d_emb), lambda bi, j, q: (0, 0)),         # pos emb z
            pl.BlockSpec((d_emb, d_hidden), lambda bi, j, q: (0, 0)),  # W1
            pl.BlockSpec((1, d_hidden), lambda bi, j, q: (0, 0)),      # b1
            pl.BlockSpec((d_hidden, tn), lambda bi, j, q: (0, j)),     # W2 channel tile
            pl.BlockSpec((1, tn), lambda bi, j, q: (0, j)),            # b2 channel tile
            pl.BlockSpec((None, l, tn), lambda bi, j, q: (bi, 0, j)),  # x (all rows; block
                                                                       #  const over q -> no re-DMA)
        ],
        out_specs=pl.BlockSpec((None, tl, tn), lambda bi, j, q: (bi, q, j)),
        scratch_shapes=[
            pltpu.VMEM((l, tn), jnp.float32),        # implicit filter k (this channel tile)
            pltpu.VMEM((2 * tl, tn), jnp.float32),   # [tl zeros ; x[0:tl]] causal pad
        ],
        compiler_params=pltpu.CompilerParams(
            dimension_semantics=("parallel", "parallel", "arbitrary"),
            vmem_limit_bytes=vmem_limit,
        ),
        cost_estimate=pl.CostEstimate(
            flops=int(flops), transcendentals=0, bytes_accessed=int(bytes_accessed)),
    )(z, w1, b1, w2, b2, x)


# ---------------------------------------------------------------------------
# Deterministic parameter / positional-embedding setup (plain JAX glue)
# ---------------------------------------------------------------------------
def init_params(key, d_model, l_max, d_emb=3, d_hidden=16):
    assert d_emb % 2 != 0 and d_emb >= 3
    bands = (d_emb - 1) // 2
    t = jnp.linspace(0.0, 1.0, l_max)[None, :, None]                   # (1, L, 1)
    t_rescaled = jnp.linspace(0.0, l_max - 1, l_max)[None, :, None]    # (1, L, 1)
    w = 2.0 * math.pi * t_rescaled / l_max                             # (1, L, 1)
    f = jnp.linspace(1e-4, bands - 1, bands)[None, None]               # (1, 1, bands)
    theta = f * w                                                      # (1, L, bands)
    # exp(-1j * theta) -> real = cos(theta), imag = -sin(theta)
    z = jnp.concatenate([t, jnp.cos(theta), -jnp.sin(theta)], axis=-1) # (1, L, d_emb)
    z = z.astype(jnp.float32)

    k1, k2, k3, k4 = jax.random.split(key, 4)
    lim1 = 1.0 / math.sqrt(d_emb)
    lim2 = 1.0 / math.sqrt(d_hidden)
    # weights stored already transposed so the kernel computes z @ W1, h @ W2
    w1 = jax.random.uniform(k1, (d_emb, d_hidden), jnp.float32, -lim1, lim1)
    b1 = jax.random.uniform(k2, (1, d_hidden), jnp.float32, -lim1, lim1)
    w2 = jax.random.uniform(k3, (d_hidden, d_model), jnp.float32, -lim2, lim2)
    b2 = jax.random.uniform(k4, (1, d_model), jnp.float32, -lim2, lim2)
    return dict(z=z, w1=w1, b1=b1, w2=w2, b2=b2)


def reference(x, params):
    """Pure-JAX reference of the same forward (filter MLP + causal conv + residual)."""
    b, l, d = x.shape
    z = params["z"][0, :l]
    h = jnp.maximum(z @ params["w1"] + params["b1"], 0.0)
    k = h @ params["w2"] + params["b2"]                   # (l, d)
    diff = jnp.arange(l)[:, None] - jnp.arange(l)[None, :]
    toep = jnp.where(diff[..., None] >= 0, k[jnp.clip(diff, 0, l - 1)], 0.0)  # (l, l, d)
    y = jnp.einsum("tsc,bsc->btc", toep, x)
    return (y + x).astype(x.dtype)


if __name__ == "__main__":
    def run_case(batch, l_max, d_model):
        key = jax.random.PRNGKey(0)
        k_params, k_x = jax.random.split(key)
        params = init_params(k_params, d_model, l_max)
        x = jax.random.normal(k_x, (batch, l_max, d_model), jnp.float32)

        y = implicit_long_convolution(x, params)
        jax.block_until_ready(y)

        y_ref = reference(x, params)
        assert y.shape == (batch, l_max, d_model) and y.dtype == x.dtype
        assert jnp.allclose(y, y_ref, atol=1e-3, rtol=1e-3), \
            f"mismatch vs reference for shape {x.shape}"

    # Small shape consistent with the module defaults.
    run_case(batch=2, l_max=8, d_model=32)
    # Multi-tile shape: exercises the blocked shift loop, scratch persistence across
    # query tiles and the lane-dense (128-wide) channel tiling.
    run_case(batch=2, l_max=256, d_model=128)

    print("KERNEL_OK")
</pallas_src>

<mosaic_0001>
module attributes {stable_mosaic.version = 11 : i64} {
  func.func @_implicit_conv_kernel(%arg0: i32, %arg1: i32, %arg2: i32, %arg3: memref<8x3xf32, #tpu.memory_space<vmem>>, %arg4: memref<3x16xf32, #tpu.memory_space<vmem>>, %arg5: memref<1x16xf32, #tpu.memory_space<vmem>>, %arg6: memref<16x32xf32, #tpu.memory_space<vmem>>, %arg7: memref<1x32xf32, #tpu.memory_space<vmem>>, %arg8: memref<1x8x32xf32, #tpu.memory_space<vmem>>, %arg9: memref<1x8x32xf32, #tpu.memory_space<vmem>>, %arg10: memref<8x32xf32, #tpu.memory_space<vmem>>, %arg11: memref<16x32xf32, #tpu.memory_space<vmem>>) attributes {dimension_semantics = [#tpu.dimension_semantics<parallel>, #tpu.dimension_semantics<parallel>, #tpu.dimension_semantics<arbitrary>], iteration_bounds = array<i64: 2, 1, 1>, scalar_prefetch = 0 : i64, scratch_operands = 2 : i64, tpu.core_type = #tpu.core_type<tc>, window_params = [{pipeline_mode = #tpu.pipeline_mode<synchronous>, transform_indices = @transform_0, window_bounds = array<i64: 8, 3>}, {pipeline_mode = #tpu.pipeline_mode<synchronous>, transform_indices = @transform_1, window_bounds = array<i64: 3, 16>}, {pipeline_mode = #tpu.pipeline_mode<synchronous>, transform_indices = @transform_2, window_bounds = array<i64: 1, 16>}, {transform_indices = @transform_3, window_bounds = array<i64: 16, 32>}, {transform_indices = @transform_4, window_bounds = array<i64: 1, 32>}, {transform_indices = @transform_5, window_bounds = array<i64: 1, 8, 32>}, {transform_indices = @transform_6, window_bounds = array<i64: 1, 8, 32>}]} {
    %c8_i32 = arith.constant 8 : i32
    %0 = arith.muli %arg2, %c8_i32 : i32
    %c0_i32 = arith.constant 0 : i32
    %1 = arith.cmpi eq, %arg2, %c0_i32 : i32
    %2 = arith.extui %1 : i1 to i32
    %c0_i32_0 = arith.constant 0 : i32
    %3 = arith.cmpi ne, %2, %c0_i32_0 : i32
    scf.if %3 {
      %c0_29 = arith.constant 0 : index
      %c0_30 = arith.constant 0 : index
      %84 = vector.load %arg3[%c0_29, %c0_30] : memref<8x3xf32, #tpu.memory_space<vmem>>, vector<8x3xf32>
      %c0_31 = arith.constant 0 : index
      %c0_32 = arith.constant 0 : index
      %85 = vector.load %arg4[%c0_31, %c0_32] : memref<3x16xf32, #tpu.memory_space<vmem>>, vector<3x16xf32>
      %cst = arith.constant dense<0.000000e+00> : vector<8x16xf32>
      %86 = tpu.matmul %84, %85, %cst {dimension_numbers = #tpu.dot_dimension_numbers<[1], [0], [0], [1], [0, 0, 1, 1], [], []>} : vector<8x3xf32>, vector<3x16xf32>, vector<8x16xf32> -> vector<8x16xf32>
      %c0_33 = arith.constant 0 : index
      %c0_34 = arith.constant 0 : index
      %87 = vector.load %arg5[%c0_33, %c0_34] : memref<1x16xf32, #tpu.memory_space<vmem>>, vector<1x16xf32>
      %88 = vector.broadcast %87 : vector<1x16xf32> to vector<8x16xf32>
      %89 = arith.addf %86, %88 : vector<8x16xf32>
      %cst_35 = arith.constant 0.000000e+00 : f32
      %90 = vector.broadcast %cst_35 : f32 to vector<8x16xf32>
      %91 = arith.maximumf %89, %90 : vector<8x16xf32>
      %c0_36 = arith.constant 0 : index
      %c0_37 = arith.constant 0 : index
      %92 = vector.load %arg6[%c0_36, %c0_37] : memref<16x32xf32, #tpu.memory_space<vmem>>, vector<16x32xf32>
      %cst_38 = arith.constant dense<0.000000e+00> : vector<8x32xf32>
      %93 = tpu.matmul %91, %92, %cst_38 {dimension_numbers = #tpu.dot_dimension_numbers<[1], [0], [0], [1], [0, 0, 1, 1], [], []>} : vector<8x16xf32>, vector<16x32xf32>, vector<8x32xf32> -> vector<8x32xf32>
      %c0_39 = arith.constant 0 : index
      %c0_40 = arith.constant 0 : index
      %94 = vector.load %arg7[%c0_39, %c0_40] : memref<1x32xf32, #tpu.memory_space<vmem>>, vector<1x32xf32>
      %95 = vector.broadcast %94 : vector<1x32xf32> to vector<8x32xf32>
      %96 = arith.addf %93, %95 : vector<8x32xf32>
      %c0_41 = arith.constant 0 : index
      %c0_42 = arith.constant 0 : index
      %97 = vector.load %arg10[%c0_41, %c0_42] : memref<8x32xf32, #tpu.memory_space<vmem>>, vector<8x32xf32>
      tpu.vector_store %arg10[%c0_41, %c0_42], %96 {strides = array<i32>} : memref<8x32xf32, #tpu.memory_space<vmem>>, vector<8x32xf32>,
      %cst_43 = arith.constant 0.000000e+00 : f32
      %98 = vector.broadcast %cst_43 : f32 to vector<8x32xf32>
      %c0_44 = arith.constant 0 : index
      %c0_45 = arith.constant 0 : index
      %99 = vector.load %arg11[%c0_44, %c0_45] : memref<16x32xf32, #tpu.memory_space<vmem>>, vector<8x32xf32>
      tpu.vector_store %arg11[%c0_44, %c0_45], %98 {strides = array<i32>} : memref<16x32xf32, #tpu.memory_space<vmem>>, vector<8x32xf32>,
      %c0_46 = arith.constant 0 : index
      %c0_47 = arith.constant 0 : index
      %c0_48 = arith.constant 0 : index
      %100 = vector.load %arg8[%c0_46, %c0_47, %c0_48] : memref<1x8x32xf32, #tpu.memory_space<vmem>>, vector<1x8x32xf32>
      %101 = vector.shape_cast %100 : vector<1x8x32xf32> to vector<8x32xf32>
      %c8 = arith.constant 8 : index
      %c0_49 = arith.constant 0 : index
      %102 = vector.load %arg11[%c8, %c0_49] : memref<16x32xf32, #tpu.memory_space<vmem>>, vector<8x32xf32>
      tpu.vector_store %arg11[%c8, %c0_49], %101 {strides = array<i32>} : memref<16x32xf32, #tpu.memory_space<vmem>>, vector<8x32xf32>,
    } else {
    }
    %4 = tpu.assume_multiple %0, 8 : i32
    %c0 = arith.constant 0 : index
    %5 = arith.index_cast %4 : i32 to index
    %c0_1 = arith.constant 0 : index
    %6 = vector.load %arg8[%c0, %5, %c0_1] : memref<1x8x32xf32, #tpu.memory_space<vmem>>, vector<1x8x32xf32>
    %7 = vector.shape_cast %6 : vector<1x8x32xf32> to vector<8x32xf32>
    %c1_i32 = arith.constant 1 : i32
    %8 = arith.muli %arg2, %c1_i32 : i32
    %c0_i32_2 = arith.constant 0 : i32
    %9 = arith.subi %8, %c0_i32_2 : i32
    %10 = arith.addi %c0_i32_2, %9 : i32
    %c1_i32_3 = arith.constant 1 : i32
    %11 = scf.for %arg12 = %c0_i32_2 to %10 step %c1_i32_3 iter_args(%arg13 = %7) -> (vector<8x32xf32>)  : i32 {
      %c8_i32_29 = arith.constant 8 : i32
      %84 = arith.muli %arg12, %c8_i32_29 : i32
      %85 = tpu.assume_multiple %84, 8 : i32
      %86 = arith.index_cast %85 : i32 to index
      %c0_30 = arith.constant 0 : index
      %87 = vector.load %arg10[%86, %c0_30] : memref<8x32xf32, #tpu.memory_space<vmem>>, vector<8x32xf32>
      %88 = arith.subi %0, %85 : i32
      %c0_i32_31 = arith.constant 0 : i32
      %89 = arith.subi %88, %c0_i32_31 : i32
      %c0_32 = arith.constant 0 : index
      %90 = arith.index_cast %89 : i32 to index
      %c0_33 = arith.constant 0 : index
      %91 = vector.load %arg8[%c0_32, %90, %c0_33] : memref<1x8x32xf32, #tpu.memory_space<vmem>>, vector<1x8x32xf32>
      %92 = vector.shape_cast %91 : vector<1x8x32xf32> to vector<8x32xf32>
      %93 = vector.extract_strided_slice %87 {offsets = [0, 0], sizes = [1, 32], strides = [1, 1]} : vector<8x32xf32> to vector<1x32xf32>
      %94 = vector.broadcast %93 : vector<1x32xf32> to vector<8x32xf32>
      %95 = arith.mulf %92, %94 : vector<8x32xf32>
      %96 = arith.addf %arg13, %95 : vector<8x32xf32>
      %97 = arith.subi %0, %85 : i32
      %c1_i32_34 = arith.constant 1 : i32
      %98 = arith.subi %97, %c1_i32_34 : i32
      %c0_35 = arith.constant 0 : index
      %99 = arith.index_cast %98 : i32 to index
      %c0_36 = arith.constant 0 : index
      %100 = vector.load %arg8[%c0_35, %99, %c0_36] : memref<1x8x32xf32, #tpu.memory_space<vmem>>, vector<1x8x32xf32>
      %101 = vector.shape_cast %100 : vector<1x8x32xf32> to vector<8x32xf32>
      %102 = vector.extract_strided_slice %87 {offsets = [1, 0], sizes = [1, 32], strides = [1, 1]} : vector<8x32xf32> to vector<1x32xf32>
      %103 = vector.broadcast %102 : vector<1x32xf32> to vector<8x32xf32>
      %104 = arith.mulf %101, %103 : vector<8x32xf32>
      %105 = arith.addf %96, %104 : vector<8x32xf32>
      %106 = arith.subi %0, %85 : i32
      %c2_i32_37 = arith.constant 2 : i32
      %107 = arith.subi %106, %c2_i32_37 : i32
      %c0_38 = arith.constant 0 : index
      %108 = arith.index_cast %107 : i32 to index
      %c0_39 = arith.constant 0 : index
      %109 = vector.load %arg8[%c0_38, %108, %c0_39] : memref<1x8x32xf32, #tpu.memory_space<vmem>>, vector<1x8x32xf32>
      %110 = vector.shape_cast %109 : vector<1x8x32xf32> to vector<8x32xf32>
      %111 = vector.extract_strided_slice %87 {offsets = [2, 0], sizes = [1, 32], strides = [1, 1]} : vector<8x32xf32> to vector<1x32xf32>
      %112 = vector.broadcast %111 : vector<1x32xf32> to vector<8x32xf32>
      %113 = arith.mulf %110, %112 : vector<8x32xf32>
      %114 = arith.addf %105, %113 : vector<8x32xf32>
      %115 = arith.subi %0, %85 : i32
      %c3_i32_40 = arith.constant 3 : i32
      %116 = arith.subi %115, %c3_i32_40 : i32
      %c0_41 = arith.constant 0 : index
      %117 = arith.index_cast %116 : i32 to index
      %c0_42 = arith.constant 0 : index
      %118 = vector.load %arg8[%c0_41, %117, %c0_42] : memref<1x8x32xf32, #tpu.memory_space<vmem>>, vector<1x8x32xf32>
      %119 = vector.shape_cast %118 : vector<1x8x32xf32> to vector<8x32xf32>
      %120 = vector.extract_strided_slice %87 {offsets = [3, 0], sizes = [1, 32], strides = [1, 1]} : vector<8x32xf32> to vector<1x32xf32>
      %121 = vector.broadcast %120 : vector<1x32xf32> to vector<8x32xf32>
      %122 = arith.mulf %119, %121 : vector<8x32xf32>
      %123 = arith.addf %114, %122 : vector<8x32xf32>
      %124 = arith.subi %0, %85 : i32
      %c4_i32_43 = arith.constant 4 : i32
      %125 = arith.subi %124, %c4_i32_43 : i32
      %c0_44 = arith.constant 0 : index
      %126 = arith.index_cast %125 : i32 to index
      %c0_45 = arith.constant 0 : index
      %127 = vector.load %arg8[%c0_44, %126, %c0_45] : memref<1x8x32xf32, #tpu.memory_space<vmem>>, vector<1x8x32xf32>
      %128 = vector.shape_cast %127 : vector<1x8x32xf32> to vector<8x32xf32>
      %129 = vector.extract_strided_slice %87 {offsets = [4, 0], sizes = [1, 32], strides = [1, 1]} : vector<8x32xf32> to vector<1x32xf32>
      %130 = vector.broadcast %129 : vector<1x32xf32> to vector<8x32xf32>
      %131 = arith.mulf %128, %130 : vector<8x32xf32>
      %132 = arith.addf %123, %131 : vector<8x32xf32>
      %133 = arith.subi %0, %85 : i32
      %c5_i32_46 = arith.constant 5 : i32
      %134 = arith.subi %133, %c5_i32_46 : i32
      %c0_47 = arith.constant 0 : index
      %135 = arith.index_cast %134 : i32 to index
      %c0_48 = arith.constant 0 : index
      %136 = vector.load %arg8[%c0_47, %135, %c0_48] : memref<1x8x32xf32, #tpu.memory_space<vmem>>, vector<1x8x32xf32>
      %137 = vector.shape_cast %136 : vector<1x8x32xf32> to vector<8x32xf32>
      %138 = vector.extract_strided_slice %87 {offsets = [5, 0], sizes = [1, 32], strides = [1, 1]} : vector<8x32xf32> to vector<1x32xf32>
      %139 = vector.broadcast %138 : vector<1x32xf32> to vector<8x32xf32>
      %140 = arith.mulf %137, %139 : vector<8x32xf32>
      %141 = arith.addf %132, %140 : vector<8x32xf32>
      %142 = arith.subi %0, %85 : i32
      %c6_i32_49 = arith.constant 6 : i32
      %143 = arith.subi %142, %c6_i32_49 : i32
      %c0_50 = arith.constant 0 : index
      %144 = arith.index_cast %143 : i32 to index
      %c0_51 = arith.constant 0 : index
      %145 = vector.load %arg8[%c0_50, %144, %c0_51] : memref<1x8x32xf32, #tpu.memory_space<vmem>>, vector<1x8x32xf32>
      %146 = vector.shape_cast %145 : vector<1x8x32xf32> to vector<8x32xf32>
      %147 = vector.extract_strided_slice %87 {offsets = [6, 0], sizes = [1, 32], strides = [1, 1]} : vector<8x32xf32> to vector<1x32xf32>
      %148 = vector.broadcast %147 : vector<1x32xf32> to vector<8x32xf32>
      %149 = arith.mulf %146, %148 : vector<8x32xf32>
      %150 = arith.addf %141, %149 : vector<8x32xf32>
      %151 = arith.subi %0, %85 : i32
      %c7_i32_52 = arith.constant 7 : i32
      %152 = arith.subi %151, %c7_i32_52 : i32
      %c0_53 = arith.constant 0 : index
      %153 = arith.index_cast %152 : i32 to index
      %c0_54 = arith.constant 0 : index
      %154 = vector.load %arg8[%c0_53, %153, %c0_54] : memref<1x8x32xf32, #tpu.memory_space<vmem>>, vector<1x8x32xf32>
      %155 = vector.shape_cast %154 : vector<1x8x32xf32> to vector<8x32xf32>
      %156 = vector.extract_strided_slice %87 {offsets = [7, 0], sizes = [1, 32], strides = [1, 1]} : vector<8x32xf32> to vector<1x32xf32>
      %157 = vector.broadcast %156 : vector<1x32xf32> to vector<8x32xf32>
      %158 = arith.mulf %155, %157 : vector<8x32xf32>
      %159 = arith.addf %150, %158 : vector<8x32xf32>
      scf.yield %159 : vector<8x32xf32>
    }
    %c0_i32_4 = arith.constant 0 : i32
    %c8_i32_5 = arith.constant 8 : i32
    %12 = arith.muli %c0_i32_4, %c8_i32_5 : i32
    %13 = tpu.assume_multiple %12, 8 : i32
    %14 = arith.addi %0, %13 : i32
    %15 = arith.index_cast %14 : i32 to index
    %c0_6 = arith.constant 0 : index
    %16 = vector.load %arg10[%15, %c0_6] : memref<8x32xf32, #tpu.memory_space<vmem>>, vector<8x32xf32>
    %c0_i32_7 = arith.constant 0 : i32
    %17 = arith.addi %13, %c0_i32_7 : i32
    %c8_i32_8 = arith.constant 8 : i32
    %18 = arith.subi %c8_i32_8, %17 : i32
    %19 = arith.index_cast %18 : i32 to index
    %c0_9 = arith.constant 0 : index
    %20 = vector.load %arg11[%19, %c0_9] : memref<16x32xf32, #tpu.memory_space<vmem>>, vector<8x32xf32>
    %21 = vector.extract_strided_slice %16 {offsets = [0, 0], sizes = [1, 32], strides = [1, 1]} : vector<8x32xf32> to vector<1x32xf32>
    %22 = vector.broadcast %21 : vector<1x32xf32> to vector<8x32xf32>
    %23 = arith.mulf %20, %22 : vector<8x32xf32>
    %24 = arith.addf %11, %23 : vector<8x32xf32>
    %c1_i32_10 = arith.constant 1 : i32
    %25 = arith.addi %13, %c1_i32_10 : i32
    %c8_i32_11 = arith.constant 8 : i32
    %26 = arith.subi %c8_i32_11, %25 : i32
    %27 = arith.index_cast %26 : i32 to index
    %c0_12 = arith.constant 0 : index
    %28 = vector.load %arg11[%27, %c0_12] : memref<16x32xf32, #tpu.memory_space<vmem>>, vector<8x32xf32>
    %29 = vector.extract_strided_slice %16 {offsets = [1, 0], sizes = [1, 32], strides = [1, 1]} : vector<8x32xf32> to vector<1x32xf32>
    %30 = vector.broadcast %29 : vector<1x32xf32> to vector<8x32xf32>
    %31 = arith.mulf %28, %30 : vector<8x32xf32>
    %32 = arith.addf %24, %31 : vector<8x32xf32>
    %c2_i32 = arith.constant 2 : i32
    %33 = arith.addi %13, %c2_i32 : i32
    %c8_i32_13 = arith.constant 8 : i32
    %34 = arith.subi %c8_i32_13, %33 : i32
    %35 = arith.index_cast %34 : i32 to index
    %c0_14 = arith.constant 0 : index
    %36 = vector.load %arg11[%35, %c0_14] : memref<16x32xf32, #tpu.memory_space<vmem>>, vector<8x32xf32>
    %37 = vector.extract_strided_slice %16 {offsets = [2, 0], sizes = [1, 32], strides = [1, 1]} : vector<8x32xf32> to vector<1x32xf32>
    %38 = vector.broadcast %37 : vector<1x32xf32> to vector<8x32xf32>
    %39 = arith.mulf %36, %38 : vector<8x32xf32>
    %40 = arith.addf %32, %39 : vector<8x32xf32>
    %c3_i32 = arith.constant 3 : i32
    %41 = arith.addi %13, %c3_i32 : i32
    %c8_i32_15 = arith.constant 8 : i32
    %42 = arith.subi %c8_i32_15, %41 : i32
    %43 = arith.index_cast %42 : i32 to index
    %c0_16 = arith.constant 0 : index
    %44 = vector.load %arg11[%43, %c0_16] : memref<16x32xf32, #tpu.memory_space<vmem>>, vector<8x32xf32>
    %45 = vector.extract_strided_slice %16 {offsets = [3, 0], sizes = [1, 32], strides = [1, 1]} : vector<8x32xf32> to vector<1x32xf32>
    %46 = vector.broadcast %45 : vector<1x32xf32> to vector<8x32xf32>
    %47 = arith.mulf %44, %46 : vector<8x32xf32>
    %48 = arith.addf %40, %47 : vector<8x32xf32>
    %c4_i32 = arith.constant 4 : i32
    %49 = arith.addi %13, %c4_i32 : i32
    %c8_i32_17 = arith.constant 8 : i32
    %50 = arith.subi %c8_i32_17, %49 : i32
    %51 = arith.index_cast %50 : i32 to index
    %c0_18 = arith.constant 0 : index
    %52 = vector.load %arg11[%51, %c0_18] : memref<16x32xf32, #tpu.memory_space<vmem>>, vector<8x32xf32>
    %53 = vector.extract_strided_slice %16 {offsets = [4, 0], sizes = [1, 32], strides = [1, 1]} : vector<8x32xf32> to vector<1x32xf32>
    %54 = vector.broadcast %53 : vector<1x32xf32> to vector<8x32xf32>
    %55 = arith.mulf %52, %54 : vector<8x32xf32>
    %56 = arith.addf %48, %55 : vector<8x32xf32>
    %c5_i32 = arith.constant 5 : i32
    %57 = arith.addi %13, %c5_i32 : i32
    %c8_i32_19 = arith.constant 8 : i32
    %58 = arith.subi %c8_i32_19, %57 : i32
    %59 = arith.index_cast %58 : i32 to index
    %c0_20 = arith.constant 0 : index
    %60 = vector.load %arg11[%59, %c0_20] : memref<16x32xf32, #tpu.memory_space<vmem>>, vector<8x32xf32>
    %61 = vector.extract_strided_slice %16 {offsets = [5, 0], sizes = [1, 32], strides = [1, 1]} : vector<8x32xf32> to vector<1x32xf32>
    %62 = vector.broadcast %61 : vector<1x32xf32> to vector<8x32xf32>
    %63 = arith.mulf %60, %62 : vector<8x32xf32>
    %64 = arith.addf %56, %63 : vector<8x32xf32>
    %c6_i32 = arith.constant 6 : i32
    %65 = arith.addi %13, %c6_i32 : i32
    %c8_i32_21 = arith.constant 8 : i32
    %66 = arith.subi %c8_i32_21, %65 : i32
    %67 = arith.index_cast %66 : i32 to index
    %c0_22 = arith.constant 0 : index
    %68 = vector.load %arg11[%67, %c0_22] : memref<16x32xf32, #tpu.memory_space<vmem>>, vector<8x32xf32>
    %69 = vector.extract_strided_slice %16 {offsets = [6, 0], sizes = [1, 32], strides = [1, 1]} : vector<8x32xf32> to vector<1x32xf32>
    %70 = vector.broadcast %69 : vector<1x32xf32> to vector<8x32xf32>
    %71 = arith.mulf %68, %70 : vector<8x32xf32>
    %72 = arith.addf %64, %71 : vector<8x32xf32>
    %c7_i32 = arith.constant 7 : i32
    %73 = arith.addi %13, %c7_i32 : i32
    %c8_i32_23 = arith.constant 8 : i32
    %74 = arith.subi %c8_i32_23, %73 : i32
    %75 = arith.index_cast %74 : i32 to index
    %c0_24 = arith.constant 0 : index
    %76 = vector.load %arg11[%75, %c0_24] : memref<16x32xf32, #tpu.memory_space<vmem>>, vector<8x32xf32>
    %77 = vector.extract_strided_slice %16 {offsets = [7, 0], sizes = [1, 32], strides = [1, 1]} : vector<8x32xf32> to vector<1x32xf32>
    %78 = vector.broadcast %77 : vector<1x32xf32> to vector<8x32xf32>
    %79 = arith.mulf %76, %78 : vector<8x32xf32>
    %80 = arith.addf %72, %79 : vector<8x32xf32>
    %c1_i32_25 = arith.constant 1 : i32
    %c0_26 = arith.constant 0 : index
    %c0_27 = arith.constant 0 : index
    %c0_28 = arith.constant 0 : index
    %81 = vector.load %arg9[%c0_26, %c0_27, %c0_28] : memref<1x8x32xf32, #tpu.memory_space<vmem>>, vector<1x8x32xf32>
    %82 = vector.shape_cast %81 : vector<1x8x32xf32> to vector<8x32xf32>
    %83 = vector.shape_cast %80 : vector<8x32xf32> to vector<1x8x32xf32>
    tpu.vector_store %arg9[%c0_26, %c0_27, %c0_28], %83 {strides = array<i32>} : memref<1x8x32xf32, #tpu.memory_space<vmem>>, vector<1x8x32xf32>,
    return
  }
  func.func @transform_0(%arg0: i32, %arg1: i32, %arg2: i32) -> (i32, i32) {
    %c0_i32 = arith.constant 0 : i32
    %c0_i32_0 = arith.constant 0 : i32
    %c0_i32_1 = arith.constant 0 : i32
    return %c0_i32, %c0_i32_0 : i32, i32
  }
  func.func @transform_1(%arg0: i32, %arg1: i32, %arg2: i32) -> (i32, i32) {
    %c0_i32 = arith.constant 0 : i32
    %c0_i32_0 = arith.constant 0 : i32
    %c0_i32_1 = arith.constant 0 : i32
    return %c0_i32, %c0_i32_0 : i32, i32
  }
  func.func @transform_2(%arg0: i32, %arg1: i32, %arg2: i32) -> (i32, i32) {
    %c0_i32 = arith.constant 0 : i32
    %c0_i32_0 = arith.constant 0 : i32
    %c0_i32_1 = arith.constant 0 : i32
    return %c0_i32, %c0_i32_0 : i32, i32
  }
  func.func @transform_3(%arg0: i32, %arg1: i32, %arg2: i32) -> (i32, i32) {
    %c0_i32 = arith.constant 0 : i32
    %c0_i32_0 = arith.constant 0 : i32
    return %c0_i32, %arg1 : i32, i32
  }
  func.func @transform_4(%arg0: i32, %arg1: i32, %arg2: i32) -> (i32, i32) {
    %c0_i32 = arith.constant 0 : i32
    %c0_i32_0 = arith.constant 0 : i32
    return %c0_i32, %arg1 : i32, i32
  }
  func.func @transform_5(%arg0: i32, %arg1: i32, %arg2: i32) -> (i32, i32, i32) {
    %c0_i32 = arith.constant 0 : i32
    %c0_i32_0 = arith.constant 0 : i32
    return %arg0, %c0_i32, %arg1 : i32, i32, i32
  }
  func.func @transform_6(%arg0: i32, %arg1: i32, %arg2: i32) -> (i32, i32, i32) {
    %c0_i32 = arith.constant 0 : i32
    return %arg0, %arg2, %arg1 : i32, i32, i32
  }
}

</mosaic_0001>

<bundles_post_ra>
// kernel: tpu_custom_call.1
= control target key start
LH: loop header
LB: loop body
LE: loop exit
PB: predicated region body
PF: predicated region fallthrough
CT: control target
= control target key end

     0   :  { %s1334_s0 = inlined_call_operand.vmem [shape: f32[8,3], index: 0, kind: input, shape index: {}]   ;;  %s1335_s1 = inlined_call_operand.hbm [shape: f32[3,16], index: 1, kind: input, shape index: {}]   ;;  %s1336_s2 = inlined_call_operand.vmem [shape: f32[1,16], index: 2, kind: input, shape index: {}]   ;;  %s1337_s3 = inlined_call_operand.vmem [shape: f32[16,32], index: 3, kind: input, shape index: {}]   ;;  %s1338_s4 = inlined_call_operand.vmem [shape: f32[1,32], index: 4, kind: input, shape index: {}]   ;;  %s1339_s5 = inlined_call_operand.hbm [shape: f32[2,8,32], index: 5, kind: input, shape index: {}]   ;;  %s1340_s6 = inlined_call_operand.hbm [shape: f32[2,8,32], index: 6, kind: output, shape index: {}]  }
   0x1   :  { %1343 = sst [smem:[#allocation14_spill]] %s1335_s1 }
   0x2   :  { %11 = vsyncpa [#allocation5], 0 }
   0x3   :  { %12 = vsyncpa [#allocation8], 0 }
   0x4   :  { %14 = vsyncpa [#allocation8 + $0x1], 0 }
   0x5   :  { %15 = vsyncpa [#allocation6], 0 }
   0x6   :  { %17 = vsyncpa [#allocation6 + $0x1], 0  ;;  %s1150_s21 = smov 0   ;;  %s1152_s22 = smov 0  }
   0x7   :  { %s1154_s23 = smov 0   ;;  %s1156_s24 = smov 0  }
   0x8   :  { %s1158_s25 = smov 0   ;;  %s1160_s26 = smov 0  }
   0x9 LB: > { %s848_s27 = sadd.s32 4294967295, %s1108_s26   ;;  %s849_s28 = sadd.s32 4294967294, %s1108_s26   ;;  %s1108_s26 = sphi %s1160_s26, %s23_s26   ;;  %s1104_s25 = sphi %s1158_s25, %s1362_s25   ;;  %s1100_s24 = sphi %s1156_s24, %s1361_s24   ;;  %s1096_s23 = sphi %s1154_s23, %s1360_s23   ;;  %s1092_s22 = sphi %s1152_s22, %s1359_s22   ;;  %s1088_s21 = sphi %s1150_s21, %s1358_s21  }
   0xa   : > { %p179_p0 = scmp.ne.s32.totalorder %s1092_s22, %s1088_s21  ;;  %p1184_p1 = scmp.eq.s32.totalorder %s848_s27, 0 }
   0xb   : > { %p1188_p2 = scmp.eq.s32.totalorder %s848_s27, 1  ;;  %p213_p3 = scmp.eq.s32.totalorder %s849_s28, 1 }
   0xc   : > { %p1194_p4 = por %p1184_p1, %p179_p0  ;;  %p850_p5 = scmp.ge.s32.totalorder %s1108_s26, 1 }
   0xd   : > { %p1199_p6 = por %p213_p3, %p179_p0  ;;  %p220_p7 = scmp.lt.s32.totalorder %s1108_s26, 3 }
   0xe   : > { %s1346_s7 = scalar_select %p1194_p4, 1, 0 }
   0xf   : > { %s1347_s8 = scalar_select %p1199_p6, 1, 0 }
  0x10   : > { %p1204_p8 = pnand %p850_p5, %p220_p7  ;;  %s1110_s10 = smov [#allocation4]  }
  0x11   : > { %s236_s11 = sshll.u32 %s1110_s10, 4  ;;  %s42_s13 = sadd.s32 1, %s1104_s25  ;;  %s237_s11 = int_to_ptr.vmem [resolvable:$true] %s236_s11 }
  0x12   : > { %p903_p10 = pneg %p1204_p8  ;;  %s166_s14 = sadd.s32 1, %s1096_s23 }
  0x13   : > { %p44_p12 = scmp.ge.s32.totalorder %s42_s13, 2  ;;  %s981_s15 = scalar_lea.vmem %s237_s11, 64 }
  0x14   : > { %p1213_p11 = pnand %p903_p10, %p1184_p1  ;;  %p982_p0 = scmp.ne.s32.totalorder %s237_s11, %s981_s15 }
  0x15   : > { %p989_p7 = scmp.lt.s32.totalorder %s237_s11, %s237_s11  ;;  %p990_p6 = scmp.lt.s32.totalorder %s981_s15, %s981_s15 }
  0x16   : > { %p972_p13 = pneg %p1213_p11 }
  0x17   : > { %p991_p9 = por %p990_p6, %p989_p7 }
  0x18   : > { %p984_p3 = pnand %p982_p0, %p972_p13 }
  0x1a   : > { %p985_p5 = pneg %p984_p3 }
  0x1c   : > { %p992_p4 = pnand %p991_p9, %p985_p5 }
  0x1e   : > { %995 = shalt.err (!%p992_p4)
}
  0x1f   : > { %s1350_s1 = sld [smem:[#allocation14_spill]]  ;;  %s1364_s13 = smov (%p44_p12, %s42_s13), 0 }
  0x20   : > { %1351 = sst [smem:[#allocation13_spill]] %s1364_s13  ;;  %p173_p6 = scmp.ne.s32.totalorder %s1096_s23, %s1092_s22 }
  0x21   : > { %p174_p4 = scmp.eq.s32.totalorder %s1108_s26, 0  ;;  %s161_s18 = ssub.s32 %s1104_s25, %s1364_s13 }
  0x22   : > { %p916_p9 = scmp.lt.s32.totalorder %s1108_s26, 2  ;;  %p164_p10 = scmp.eq.s32.totalorder %s161_s18, 0 }
  0x23   : > { %p175_p13 = por %p174_p4, %p173_p6  ;;  %p1236_p0 = por %p1188_p2, %p173_p6 }
  0x24   : > { %s263_s20 = sand.u32 1, %s1096_s23   ;;  %s856_s10 = sshll.u32 %s1104_s25, 7 }
  0x25   : > { %906 = dma.hbm_to_vmem [thread:$0]  (!%p1213_p11), %s1350_s1, 64, %s237_s11, [#allocation5]  }
  0x26   : > { %s1242_s27 = scalar_select %p164_p10, %s1096_s23, %s166_s14  }
  0x27   : > { %s855_s28 = sshll.u32 %s263_s20, 3  ;;  %s273_s15 = scalar_lea.hbm %s1339_s5, %s856_s10 }
  0x28   : > { %s267_s16 = scalar_lea.vmem [#allocation7], %s855_s28  ;;  %p1248_p11 = pnand %p916_p9, %p175_p13 }
  0x29   : > { %s275_s17 = sshll.u32 %s267_s16, 4  ;;  %s264_s30 = scalar_lea.sflag [#allocation8], %s263_s20  ;;  %s276_s17 = int_to_ptr.vmem [resolvable:$true] %s275_s17 }
  0x2a   : > { %p998_p2 = pneg %p1248_p11  ;;  %s1009_s1 = scalar_lea.vmem %s276_s17, 128 }
  0x2b   : > { %p1010_p12 = scmp.ne.s32.totalorder %s276_s17, %s1009_s1  ;;  %s1111_s14 = smov [#allocation7]  }
  0x2c   : > { %s1014_s13 = sshll.u32 %s1111_s14, 4  ;;  %s1015_s13 = int_to_ptr.vmem [resolvable:$false] %s1014_s13 }
  0x2d   : > { %p1012_p3 = pnand %p1010_p12, %p998_p2  ;;  %s1016_s11 = scalar_lea.vmem %s1015_s13, 256 }
  0x2e   : > { %p1017_p7 = scmp.lt.s32.totalorder %s276_s17, %s1015_s13  ;;  %p1018_p6 = scmp.lt.s32.totalorder %s1016_s11, %s1009_s1 }
  0x2f   : > { %p1013_p5 = pneg %p1012_p3 }
  0x30   : > { %p1019_p4 = por %p1018_p6, %p1017_p7 }
  0x32   : > { %p1020_p10 = pnand %p1019_p4, %p1013_p5 }
  0x34   : > { %1023 = shalt.err (!%p1020_p10)
}
  0x35   : > { %910 = dma.hbm_to_vmem [thread:$0]  (!%p1248_p11), %s273_s15, 128, %s276_s17, %s264_s30  }
  0x36   : > { %284 = sbr.rel (%p1204_p8) target bundleno = 501 (0x1f5), region = 44 }
  0x3b   : > { %1075 = dma.done.wait (%p1184_p1), [#allocation5], 64  }
  0x3c   : > { %1077 = vsyncadd (%p1184_p1), [#allocation5], 4294967232  ;;  %s1263_s20 = sand.u32 1, %s1092_s22   ;;  %p1354_p9 = scmp.ne.s32.totalorder %s1346_s7, 0 }
  0x3d   : > { %s859_s1 = sshll.u32 %s1263_s20, 3  ;;  %s291_s13 = scalar_lea.sflag [#allocation8], %s1263_s20 }
  0x3e   : > { %s294_s28 = scalar_lea.vmem [#allocation7], %s859_s1 }
  0x3f   : > { %1079 = dma.done.wait (%p1354_p9), %s291_s13, 128  }
  0x40   : > { %1081 = vsyncadd (%p1354_p9), %s291_s13, 4294967168  ;;  %v1112_v0 = vmov 0.0   ;;  %vm1113_vm0 = vmmov 0   ;;  %vm355_vm1 = vcmask 1042432   ;;  %vm351_vm2 = vcmask 23552   ;;  %v342_v2 = vld [vmem:[%s1334_s0] sm:$0xff] }
  0x41   : > { %883 = vmatprep.subr.mxu0 %v1112_v0  ;;  %885 = vmatprep.mubr.msk.f32.mxu0 %vm1113_vm0, %v1112_v0  ;;  %v343_v1 = vld [vmem:[#allocation4] sm:$0x7]  ;;  %v430_v4 = vld [vmem:[%s1337_s3] sm:$0xff]  ;;  %vm439_vm3 = vcmask 130048   ;;  %vm513_vm4 = vcmask 261120   ;;  %v516_v10 = vld [vmem:[%s294_s28] sm:$0xff]  ;;  %v608_v12 = vlaneseq }
  0x42   : > { %888 = vmatprep.subr.mxu1 %v1112_v0  ;;  %892 = vmatprep.mubr.msk.f32.mxu1 %vm1113_vm0, %v1112_v0  ;;  %v431_v3 = vld [vmem:[%s1337_s3 + $0x8] sm:$0xff]  ;;  %v861_v5 = vld [vmem:[%s1336_s2] ss:$0 sm:$0xff]  ;;  %515 = vst.msk [vmem:[#allocation3] sm:$0xff] %vm513_vm4, %v1112_v0  ;;  %517 = vst.msk [vmem:[#allocation3 + $0x8] sm:$0xff] %vm513_vm4, %v516_v10  ;;  %s875_s14 = sshll.u32 %s1100_s24, 7 }
  0x43   : > { %884 = vmatpush3.msk.msra.mxu0 %vm355_vm1, %v343_v1  ;;  %889 = vmatpush3.msra.mxu1 %v431_v3  ;;  %v864_v11 = vld [vmem:[%s1338_s4] ss:$0 sm:$0xff]  ;;  %v609_v16 = vshrl.u32 %v608_v12, 7  ;;  %s329_s11 = scalar_lea.vmem [#allocation9], %s859_s1  ;;  %s693_s9 = scalar_lea.hbm %s1340_s6, %s875_s14 }
  0x44   : > { %886 = vmatmul.mubr.msk.f32.vlgmr.msra.gmra.mxu0 %vm351_vm2, %v342_v2  ;;  %890 = vmatprep.subr.mxu1 %v1112_v0  ;;  %s695_s13 = sshll.u32 %s329_s11, 4  ;;  %s680_s10 = scalar_lea.sflag [#allocation6], %s1263_s20  ;;  %s696_s13 = int_to_ptr.vmem [resolvable:$true] %s695_s13 }
  0x45   : > { %891 = vmatpush3.msra.mxu1 %v430_v4  ;;  %v610_v17 = vsub.s32 0, %v609_v16  ;;  %v619_v18 = vsub.s32 1, %v609_v16  ;;  %v628_v19 = vsub.s32 2, %v609_v16  ;;  %v637_v24 = vsub.s32 3, %v609_v16  ;;  %s1024_s12 = scalar_lea.vmem %s696_s13, 128  ;;  %s1114_s24 = smov [#allocation9]  }
  0x46   : > { %v646_v28 = vsub.s32 4, %v609_v16  ;;  %v655_v33 = vsub.s32 5, %v609_v16  ;;  %v664_v38 = vsub.s32 6, %v609_v16  ;;  %v673_v43 = vsub.s32 7, %v609_v16  ;;  %p1025_p1 = scmp.ne.s32.totalorder %s696_s13, %s1024_s12  ;;  %s1028_s7 = sshll.u32 %s1114_s24, 4  ;;  %s1029_s7 = int_to_ptr.vmem [resolvable:$false] %s1028_s7 }
  0x47   : > { %s1030_s1 = scalar_lea.vmem %s1029_s7, 256  ;;  %p1031_p11 = scmp.lt.s32.totalorder %s696_s13, %s1029_s7 }
  0x48   : > { %p1026_p8 = pnand %p1025_p1, %p1236_p0  ;;  %p1032_p2 = scmp.lt.s32.totalorder %s1030_s1, %s1024_s12 }
  0x49   : > { %v607_v21 = vld [vmem:[#allocation3 + $0x8] sm:$0xff] }
  0x4a   : > { %v616_v25 = vld [vmem:[#allocation3 + $0x7] sm:$0xff]  ;;  %p1027_p13 = pneg %p1026_p8  ;;  %p1033_p12 = por %p1032_p2, %p1031_p11 }
  0x4b   : > { %v625_v29 = vld [vmem:[#allocation3 + $0x6] sm:$0xff] }
  0x4c   : > { %v634_v34 = vld [vmem:[#allocation3 + $0x5] sm:$0xff]  ;;  %p1034_p3 = pnand %p1033_p12, %p1027_p13 }
  0x4d   : > { %v643_v39 = vld [vmem:[#allocation3 + $0x4] sm:$0xff] }
  0x4e   : > { %v652_v44 = vld [vmem:[#allocation3 + $0x3] sm:$0xff] }
  0x4f   : > { %v661_v48 = vld [vmem:[#allocation3 + $0x2] sm:$0xff] }
  0x50   : > { %v670_v52 = vld [vmem:[#allocation3 + $0x1] sm:$0xff] }
 0x104   : > { %v425_v6 = vpop.f32.mrf.mxu0 }
 0x105   : > { %v426_v7 = vadd.f32 %v861_v5, %v425_v6 }
 0x106   : > { %v887_v8 = vpop.f32.mrf.mxu0 }
 0x107   : > { %v429_v9 = vmax.f32 %v426_v7, 0.0 }
 0x109   : > { %893 = vmatmul.mubr.msk.f32.vlgmr.msra.gmra.mxu1 %vm439_vm3, %v429_v9 }
 0x1c9   : > { %v509_v13 = vpop.f32.mrf.mxu1 }
 0x1ca   : > { %v510_v14 = vadd.f32 %v864_v11, %v509_v13 }
 0x1cb   : > { %v894_v15 = vpop.f32.mrf.mxu1 }
 0x1cc   : > { %514 = vst.msk [vmem:[#allocation2] sm:$0xff] %vm513_vm4, %v510_v14 }
 0x1d3   : > { %v604_v20 = vld [vmem:[#allocation2] sm:$0xff] }
 0x1d4   : > { %v611_v22 = vrot.slane %v604_v20, %v610_v17  ;;  %v620_v23 = vrot.slane %v604_v20, %v619_v18  ;;  %v629_v27 = vrot.slane %v604_v20, %v628_v19  ;;  %v638_v32 = vrot.slane %v604_v20, %v637_v24 }
 0x1d5   : > { %v647_v37 = vrot.slane %v604_v20, %v646_v28  ;;  %v656_v42 = vrot.slane %v604_v20, %v655_v33  ;;  %v665_v47 = vrot.slane %v604_v20, %v664_v38  ;;  %v674_v51 = vrot.slane %v604_v20, %v673_v43 }
 0x1d6   : > { %v612_v26 = vmul.f32 %v611_v22, %v607_v21  ;;  %v621_v31 = vmul.f32 %v620_v23, %v616_v25  ;;  %v630_v36 = vmul.f32 %v629_v27, %v625_v29  ;;  %v639_v41 = vmul.f32 %v638_v32, %v634_v34 }
 0x1d7   : > { %v648_v46 = vmul.f32 %v647_v37, %v643_v39  ;;  %v657_v50 = vmul.f32 %v656_v42, %v652_v44  ;;  %v666_v54 = vmul.f32 %v665_v47, %v661_v48  ;;  %v675_v56 = vmul.f32 %v674_v51, %v670_v52 }
 0x1d8   : > { %v613_v30 = vadd.f32 %v612_v26, %v516_v10 }
 0x1da   : > { %v622_v35 = vadd.f32 %v621_v31, %v613_v30 }
 0x1dc   : > { %v631_v40 = vadd.f32 %v630_v36, %v622_v35 }
 0x1de   : > { %v640_v45 = vadd.f32 %v639_v41, %v631_v40 }
 0x1e0   : > { %v649_v49 = vadd.f32 %v648_v46, %v640_v45 }
 0x1e2   : > { %v658_v53 = vadd.f32 %v657_v50, %v649_v49 }
 0x1e4   : > { %v667_v55 = vadd.f32 %v666_v54, %v658_v53 }
 0x1e6   : > { %v676_v57 = vadd.f32 %v675_v56, %v667_v55 }
 0x1e8   : > { %678 = vst.msk [vmem:[%s329_s11] sm:$0xff] %vm513_vm4, %v676_v57 }
 0x1e9   : > { %1037 = shalt.err (!%p1034_p3)
}
 0x1ea   : > { %s1038_s15 = scalar_lea.hbm %s693_s9, 128  ;;  %s1042_s17 = scalar_lea.hbm %s1340_s6, 256 }
 0x1eb   : > { %p1039_p5 = scmp.ne.s32.totalorder %s693_s9, %s1038_s15  ;;  %p1043_p4 = scmp.lt.s32.totalorder %s693_s9, %s1340_s6 }
 0x1ec   : > { %p1044_p10 = scmp.lt.s32.totalorder %s1042_s17, %s1038_s15 }
 0x1ed   : > { %p1040_p7 = pnand %p1039_p5, %p1236_p0 }
 0x1ee   : > { %p1045_p9 = por %p1044_p10, %p1043_p4 }
 0x1ef   : > { %p1041_p6 = pneg %p1040_p7 }
 0x1f1   : > { %p1046_p1 = pnand %p1045_p9, %p1041_p6 }
 0x1f3   : > { %1049 = shalt.err (!%p1046_p1)
}
 0x1f4   : > { %901 = dma.vmem_to_hbm [thread:$0]  (%p1236_p0), %s696_s13, 128, %s693_s9, %s680_s10  }
 0x1f5 PF: > { %s707_s14 = sand.u32 1, %s1088_s21   ;;  %p1355_p8 = scmp.ne.s32.totalorder %s1347_s8, 0 }
 0x1f6   : > { %p1356_p13 = scmp.ge.s32.totalorder %s1108_s26, 2  ;;  %s708_s11 = scalar_lea.sflag [#allocation6], %s707_s14 }
 0x1f8   : > { %p912_p11 = pnand %p1356_p13, %p1355_p8 }
 0x1fa   : > { %p913_p2 = pneg %p912_p11 }
 0x1fc   : > { %1083 = dma.done.wait (%p913_p2), %s708_s11, 128  }
 0x1fd   : > { %1085 = vsyncadd (%p913_p2), %s708_s11, 4294967168  ;;  %s23_s26 = sadd.s32 1, %s1108_s26   ;;  %s1357_s19 = sld [smem:[#allocation13_spill]] }
 0x1fe   : > { %p20_p12 = scmp.ge.s32.totalorder %s23_s26, 4   ;;  %s1358_s21 = smov %s1092_s22 }
 0x1ff   : > { %s1359_s22 = smov %s1096_s23  ;;  %s1360_s23 = smov %s1242_s27 }
 0x200   : > { %s1361_s24 = smov %s1104_s25  ;;  %22 = sbr.rel (!%p20_p12) target bundleno = 9 (0x9), region = 141 }
 0x203   : > { %s1362_s25 = smov %s1357_s19 }
 0x205   :  { %713 = vsyncpa [#allocation5], 1 }
 0x206   :  { %715 = vsyncpa [#allocation5 + $0x1], 1 }
 0x207   :  { %716 = vsyncpa [#allocation8], 1 }
 0x208   :  { %718 = vsyncpa [#allocation8 + $0x1], 1 }
 0x209   :  { %719 = vsyncpa [#allocation6], 1 }
 0x20a   :  { %721 = vsyncpa [#allocation6 + $0x1], 1 }

</bundles_post_ra>
